<compile_context>
chip_gen: v7x
topology: tpu7x:2x2x1
jax: 0.10.0
libtpu: 0.0.40
codegen_flags: <defaults>
</compile_context>

<pallas_src>
import math
from functools import partial

import jax
import jax.numpy as jnp
from jax.experimental import pallas as pl
from jax.experimental.pallas import tpu as pltpu


def _round_up(n, m):
    return ((n + m - 1) // m) * m


def _pad_cols(a, n):
    pad = n - a.shape[-1]
    return a if pad == 0 else jnp.pad(a, ((0, 0), (0, pad)))


def _pick_group(batch, tokens, max_rows=512):
    """Batch elements per grid step: fill MXU rows, keep >=2 steps for v7x."""
    best = 1
    for g in range(1, batch + 1):
        if g * tokens > max_rows:
            break
        if batch % g:
            continue
        if batch >= 2 and batch // g < 2:
            continue  # keep >=2 grid steps so both v7x TensorCores get work
        best = g
    return best
    # TODO(synk): for B=1 on v7x, grid over M-tiles / head groups instead of
    # (B,) so the second TensorCore is not idle.


def _vmem_limit_bytes(G, P, dim, heads, head_dim, n_qkv, n_out, weight_bytes):
    f32 = 4
    total = heads * head_dim
    weights = (dim * n_qkv + total * n_out) * weight_bytes \
        + (n_qkv + n_out + 2 * dim) * f32                      # single-buffered
    io = 2 * (G * P * dim + G * P * n_out) * f32               # x / out, double-buffered
    temps = (G * P * (2 * dim + n_qkv + total + n_out)         # xn, qkv, merged, y
             + 3 * G * heads * P * head_dim                    # q3 / k3 / v3
             + 2 * G * heads * P * P) * f32                    # scores + attn
    est = weights + io + 2 * temps + (4 << 20)                 # relayout/copy headroom
    return int(min(max(est, 8 << 20), 64 << 20))               # <=64 MiB: safe on v7x too


def prepare_msa_params(params, *, heads, head_dim, weights_dtype=jnp.bfloat16):
    """One-time fusion / padding / scaling / dtype cast of the MSA parameters.

    params = (ln_gamma(1,dim), ln_beta(1,dim), Wq(dim,T), Wk(dim,T), Wv(dim,T),
              bv(1,T), Wfc(T,dim), bfc(1,dim)) with T = heads*head_dim.
    """
    g, b, wq, wk, wv, bv, wfc, bfc = params
    total = heads * head_dim
    dim_out = wfc.shape[1]
    n_qkv = _round_up(3 * total, 128)        # fused QKV width (lane-dense GEMM)
    n_out = _round_up(dim_out, 128)          # fc width (lane-dense, unmasked store)

    inv_scale = 1.0 / math.sqrt(head_dim)
    wq_scaled = wq * inv_scale               # fold 1/sqrt(d) into Q projection

    w_qkv = _pad_cols(jnp.concatenate([wq_scaled, wk, wv], axis=1), n_qkv)
    b_qkv = _pad_cols(jnp.concatenate(
        [jnp.zeros((1, 2 * total), bv.dtype), bv], axis=1), n_qkv)   # q/k biases = 0
    w_fc = _pad_cols(wfc, n_out)
    b_fc = _pad_cols(bfc, n_out)

    return (g.astype(jnp.float32), b.astype(jnp.float32),
            w_qkv.astype(weights_dtype), b_qkv.astype(jnp.float32),
            w_fc.astype(weights_dtype), b_fc.astype(jnp.float32))


def msa_kernel(x_ref, g_ref, beta_ref, wqkv_ref, bqkv_ref, wfc_ref, bfc_ref,
               o_ref, *, heads, head_dim, group, tokens, matmul_dtype):
    total = heads * head_dim
    G, P = group, tokens
    n_out = o_ref.shape[-1]

    x = x_ref[...].reshape(G * P, x_ref.shape[-1]).astype(jnp.float32)   # (G*P, dim)

    # ---- LayerNorm (eps = 1e-5, affine) — fp32 VPU math ----
    mean = jnp.mean(x, axis=-1, keepdims=True)
    xc = x - mean
    var = jnp.mean(xc * xc, axis=-1, keepdims=True)
    xn = xc * jax.lax.rsqrt(var + 1e-5)
    xn = xn * g_ref[...] + beta_ref[...]                                  # (1, dim) bcast

    # ---- Fused Q/K/V projection: one lane-dense GEMM (weights already bf16) ----
    qkv = jnp.dot(xn.astype(matmul_dtype), wqkv_ref[...],
                  preferred_element_type=jnp.float32) + bqkv_ref[...]     # (G*P, n_qkv)

    # ---- Split into heads: (G*P, 3*total) -> (G, 3*heads, P, head_dim) ----
    # TODO(synk): audit this relayout with pl.lower_as_mlir; if a materialized
    # copy shows up, switch to pltpu.einshape (lane-layout aware).
    qkv3 = qkv[:, :3 * total].reshape(G, P, 3 * heads, head_dim).transpose(0, 2, 1, 3)
    q3 = qkv3[:, :heads].reshape(G * heads, P, head_dim)          # scale pre-folded
    k3 = qkv3[:, heads:2 * heads].reshape(G * heads, P, head_dim)
    v3 = qkv3[:, 2 * heads:].reshape(G * heads, P, head_dim)

    # ---- Heads-batched attention (single einsum sequence, no per-head loop) ----
    s = jnp.einsum('hpd,hqd->hpq', q3.astype(matmul_dtype), k3.astype(matmul_dtype),
                   preferred_element_type=jnp.float32)            # (G*heads, P, P)
    # TODO(synk): mask_self=True (diagonal -inf mask) not implemented; the
    # module default is False.
    # TODO(synk): for long token counts (P ~ 577+), tile softmax over the KV
    # axis (flash-style) instead of materializing the full score tensor.
    m = jnp.max(s, axis=-1, keepdims=True)
    e = jnp.exp(s - m)
    attn = e * pl.reciprocal(jnp.sum(e, axis=-1, keepdims=True), approx=True)
    o3 = jnp.einsum('hpq,hqd->hpd', attn.astype(matmul_dtype), v3.astype(matmul_dtype),
                    preferred_element_type=jnp.float32)           # (G*heads, P, head_dim)

    # ---- Merge heads and output projection (lane-dense, unmasked store) ----
    out = o3.reshape(G, heads, P, head_dim).transpose(0, 2, 1, 3).reshape(G * P, total)
    y = jnp.dot(out.astype(matmul_dtype), wfc_ref[...],
                preferred_element_type=jnp.float32) + bfc_ref[...]
    o_ref[...] = y.reshape(G, P, n_out).astype(o_ref.dtype)


def msa_forward(x, prepared, *, heads, head_dim, group=None):
    """x: (B, P, dim); prepared = prepare_msa_params(...)."""
    g, b, w_qkv, b_qkv, w_fc, b_fc = prepared
    B, P, dim = x.shape
    total = heads * head_dim
    n_qkv = w_qkv.shape[1]
    n_out = w_fc.shape[1]

    G = _pick_group(B, P) if group is None else group
    assert B % G == 0, "batch must be divisible by the group size"

    matmul_dtype = w_qkv.dtype
    kernel = partial(msa_kernel, heads=heads, head_dim=head_dim,
                     group=G, tokens=P, matmul_dtype=matmul_dtype)

    # Constant (grid-invariant) inputs: single buffer — no pipelining benefit.
    const2d = lambda r, c: pl.BlockSpec((r, c), lambda i: (0, 0),
                                        pipeline_mode=pl.Buffered(1))

    vmem_bytes = _vmem_limit_bytes(G, P, dim, heads, head_dim, n_qkv, n_out,
                                   jnp.dtype(matmul_dtype).itemsize)

    out_padded = pl.pallas_call(
        kernel,
        out_shape=jax.ShapeDtypeStruct((B, P, n_out), x.dtype),
        grid_spec=pltpu.PrefetchScalarGridSpec(
            num_scalar_prefetch=0,
            grid=(B // G,),
            in_specs=[
                pl.BlockSpec((G, P, dim), lambda i: (i, 0, 0)),   # x (double-buffered)
                const2d(1, dim),                                  # LN gamma (f32)
                const2d(1, dim),                                  # LN beta  (f32)
                const2d(dim, n_qkv),                              # W_qkv fused (bf16, padded)
                const2d(1, n_qkv),                                # b_qkv fused (f32, padded)
                const2d(total, n_out),                            # W_fc (bf16, padded)
                const2d(1, n_out),                                # b_fc (f32, padded)
            ],
            out_specs=pl.BlockSpec((G, P, n_out), lambda i: (i, 0, 0)),
        ),
        compiler_params=pltpu.CompilerParams(
            dimension_semantics=("parallel",),
            vmem_limit_bytes=vmem_bytes),
    )(x, g, b, w_qkv, b_qkv, w_fc, b_fc)

    return out_padded[..., :dim]


def msa_reference(x, params, *, heads, head_dim):
    """Pure-JAX reference mirroring the PyTorch forward (unfused params)."""
    g, b, wq, wk, wv, bv, wfc, bfc = params
    mean = jnp.mean(x, axis=-1, keepdims=True)
    var = jnp.mean((x - mean) ** 2, axis=-1, keepdims=True)
    xn = (x - mean) / jnp.sqrt(var + 1e-5) * g[0] + b[0]
    q = xn @ wq
    k = xn @ wk
    v = xn @ wv + bv[0]
    B, P, _ = x.shape
    resh = lambda t: t.reshape(B, P, heads, head_dim).transpose(0, 2, 1, 3)
    q, k, v = resh(q), resh(k), resh(v)
    R = jnp.einsum('bhpd,bhqd->bhpq', q, k) / math.sqrt(head_dim)
    attn = jax.nn.softmax(R, axis=-1)
    out = jnp.einsum('bhpq,bhqd->bhpd', attn, v)
    out = out.transpose(0, 2, 1, 3).reshape(B, P, heads * head_dim)
    return out @ wfc + bfc[0]


if __name__ == "__main__":
    # Small shapes consistent with the module.
    B, P, dim = 2, 8, 32
    heads, head_dim = 4, 16
    total = heads * head_dim

    key = jax.random.PRNGKey(0)
    k_x, k_q, k_k, k_v, k_bv, k_fc, k_bfc = jax.random.split(key, 7)

    x = jax.random.normal(k_x, (B, P, dim), dtype=jnp.float32)

    # Deterministic parameter init (synthetic, not a checkpoint).
    params = (
        jnp.ones((1, dim), jnp.float32),                               # LN gamma
        jnp.zeros((1, dim), jnp.float32),                              # LN beta
        jax.random.normal(k_q, (dim, total), jnp.float32) * 0.05,      # Wq
        jax.random.normal(k_k, (dim, total), jnp.float32) * 0.05,      # Wk
        jax.random.normal(k_v, (dim, total), jnp.float32) * 0.05,      # Wv
        jax.random.normal(k_bv, (1, total), jnp.float32) * 0.05,       # bv
        jax.random.normal(k_fc, (total, dim), jnp.float32) * 0.05,     # Wfc
        jax.random.normal(k_bfc, (1, dim), jnp.float32) * 0.05,        # bfc
    )

    ref = msa_reference(x, params, heads=heads, head_dim=head_dim)

    # Default path: bf16 weights in HBM (native MXU dtype), f32 accumulation.
    prep_bf16 = prepare_msa_params(params, heads=heads, head_dim=head_dim)
    out = jax.block_until_ready(
        msa_forward(x, prep_bf16, heads=heads, head_dim=head_dim))
    assert out.shape == (B, P, dim)
    assert jnp.allclose(out, ref, atol=5e-2, rtol=5e-2), "bf16 mismatch vs reference"

    # f32-weights path for tight numerical validation of the kernel structure
    # (remaining slack is the EUP approximate reciprocal in the softmax denom).
    prep_f32 = prepare_msa_params(params, heads=heads, head_dim=head_dim,
                                  weights_dtype=jnp.float32)
    out32 = jax.block_until_ready(
        msa_forward(x, prep_f32, heads=heads, head_dim=head_dim))
    assert jnp.allclose(out32, ref, atol=2e-3, rtol=2e-3), "f32 mismatch vs reference"

    print("KERNEL_OK")
</pallas_src>

<mosaic_0001>
module attributes {stable_mosaic.version = 11 : i64} {
  func.func @msa_kernel(%arg0: i32, %arg1: memref<1x8x32xf32, #tpu.memory_space<vmem>>, %arg2: memref<1x32xf32, #tpu.memory_space<vmem>>, %arg3: memref<1x32xf32, #tpu.memory_space<vmem>>, %arg4: memref<32x256xbf16, #tpu.memory_space<vmem>>, %arg5: memref<1x256xf32, #tpu.memory_space<vmem>>, %arg6: memref<64x128xbf16, #tpu.memory_space<vmem>>, %arg7: memref<1x128xf32, #tpu.memory_space<vmem>>, %arg8: memref<1x8x128xf32, #tpu.memory_space<vmem>>) attributes {dimension_semantics = [#tpu.dimension_semantics<parallel>], iteration_bounds = array<i64: 2>, scalar_prefetch = 0 : i64, scratch_operands = 0 : i64, tpu.core_type = #tpu.core_type<tc>, window_params = [{transform_indices = @transform_0, window_bounds = array<i64: 1, 8, 32>}, {pipeline_mode = #tpu.pipeline_mode<synchronous>, transform_indices = @transform_1, window_bounds = array<i64: 1, 32>}, {pipeline_mode = #tpu.pipeline_mode<synchronous>, transform_indices = @transform_2, window_bounds = array<i64: 1, 32>}, {pipeline_mode = #tpu.pipeline_mode<synchronous>, transform_indices = @transform_3, window_bounds = array<i64: 32, 256>}, {pipeline_mode = #tpu.pipeline_mode<synchronous>, transform_indices = @transform_4, window_bounds = array<i64: 1, 256>}, {pipeline_mode = #tpu.pipeline_mode<synchronous>, transform_indices = @transform_5, window_bounds = array<i64: 64, 128>}, {pipeline_mode = #tpu.pipeline_mode<synchronous>, transform_indices = @transform_6, window_bounds = array<i64: 1, 128>}, {transform_indices = @transform_7, window_bounds = array<i64: 1, 8, 128>}]} {
    %c0 = arith.constant 0 : index
    %c0_0 = arith.constant 0 : index
    %c0_1 = arith.constant 0 : index
    %0 = vector.load %arg1[%c0, %c0_0, %c0_1] : memref<1x8x32xf32, #tpu.memory_space<vmem>>, vector<1x8x32xf32>
    %1 = vector.shape_cast %0 : vector<1x8x32xf32> to vector<8x32xf32>
    %cst = arith.constant dense<0.000000e+00> : vector<8xf32>
    %2 = vector.multi_reduction <add>, %1, %cst [1] : vector<8x32xf32> to vector<8xf32>
    %3 = vector.shape_cast %2 : vector<8xf32> to vector<8x1xf32>
    %cst_2 = arith.constant 3.200000e+01 : f32
    %4 = vector.broadcast %cst_2 : f32 to vector<8x1xf32>
    %5 = arith.divf %3, %4 : vector<8x1xf32>
    %6 = vector.broadcast %5 : vector<8x1xf32> to vector<8x32xf32>
    %7 = arith.subf %1, %6 : vector<8x32xf32>
    %8 = arith.mulf %7, %7 : vector<8x32xf32>
    %cst_3 = arith.constant dense<0.000000e+00> : vector<8xf32>
    %9 = vector.multi_reduction <add>, %8, %cst_3 [1] : vector<8x32xf32> to vector<8xf32>
    %10 = vector.shape_cast %9 : vector<8xf32> to vector<8x1xf32>
    %cst_4 = arith.constant 3.200000e+01 : f32
    %11 = vector.broadcast %cst_4 : f32 to vector<8x1xf32>
    %12 = arith.divf %10, %11 : vector<8x1xf32>
    %cst_5 = arith.constant 9.99999974E-6 : f32
    %13 = vector.broadcast %cst_5 : f32 to vector<8x1xf32>
    %14 = arith.addf %12, %13 : vector<8x1xf32>
    %15 = math.rsqrt %14 : vector<8x1xf32>
    %16 = vector.broadcast %15 : vector<8x1xf32> to vector<8x32xf32>
    %17 = arith.mulf %7, %16 : vector<8x32xf32>
    %c0_6 = arith.constant 0 : index
    %c0_7 = arith.constant 0 : index
    %18 = vector.load %arg2[%c0_6, %c0_7] : memref<1x32xf32, #tpu.memory_space<vmem>>, vector<1x32xf32>
    %19 = vector.broadcast %18 : vector<1x32xf32> to vector<8x32xf32>
    %20 = arith.mulf %17, %19 : vector<8x32xf32>
    %c0_8 = arith.constant 0 : index
    %c0_9 = arith.constant 0 : index
    %21 = vector.load %arg3[%c0_8, %c0_9] : memref<1x32xf32, #tpu.memory_space<vmem>>, vector<1x32xf32>
    %22 = vector.broadcast %21 : vector<1x32xf32> to vector<8x32xf32>
    %23 = arith.addf %20, %22 : vector<8x32xf32>
    %24 = arith.truncf %23 : vector<8x32xf32> to vector<8x32xbf16>
    %c0_10 = arith.constant 0 : index
    %c0_11 = arith.constant 0 : index
    %25 = vector.load %arg4[%c0_10, %c0_11] : memref<32x256xbf16, #tpu.memory_space<vmem>>, vector<32x256xbf16>
    %cst_12 = arith.constant dense<0.000000e+00> : vector<8x256xf32>
    %26 = tpu.matmul %24, %25, %cst_12 {dimension_numbers = #tpu.dot_dimension_numbers<[1], [0], [0], [1], [0, 0, 1, 1], [], []>} : vector<8x32xbf16>, vector<32x256xbf16>, vector<8x256xf32> -> vector<8x256xf32>
    %c0_13 = arith.constant 0 : index
    %c0_14 = arith.constant 0 : index
    %27 = vector.load %arg5[%c0_13, %c0_14] : memref<1x256xf32, #tpu.memory_space<vmem>>, vector<1x256xf32>
    %28 = vector.broadcast %27 : vector<1x256xf32> to vector<8x256xf32>
    %29 = arith.addf %26, %28 : vector<8x256xf32>
    %30 = vector.extract_strided_slice %29 {offsets = [0, 0], sizes = [8, 192], strides = [1, 1]} : vector<8x256xf32> to vector<8x192xf32>
    %31 = vector.shape_cast %30 : vector<8x192xf32> to vector<1x8x12x16xf32>
    %32 = tpu.transpose %31, [0, 2, 1, 3] : vector<1x8x12x16xf32> -> vector<1x12x8x16xf32>
    %33 = vector.extract_strided_slice %32 {offsets = [0, 0, 0, 0], sizes = [1, 4, 8, 16], strides = [1, 1, 1, 1]} : vector<1x12x8x16xf32> to vector<1x4x8x16xf32>
    %34 = vector.shape_cast %33 : vector<1x4x8x16xf32> to vector<4x8x16xf32>
    %35 = vector.extract_strided_slice %32 {offsets = [0, 4, 0, 0], sizes = [1, 4, 8, 16], strides = [1, 1, 1, 1]} : vector<1x12x8x16xf32> to vector<1x4x8x16xf32>
    %36 = vector.shape_cast %35 : vector<1x4x8x16xf32> to vector<4x8x16xf32>
    %37 = vector.extract_strided_slice %32 {offsets = [0, 8, 0, 0], sizes = [1, 4, 8, 16], strides = [1, 1, 1, 1]} : vector<1x12x8x16xf32> to vector<1x4x8x16xf32>
    %38 = vector.shape_cast %37 : vector<1x4x8x16xf32> to vector<4x8x16xf32>
    %39 = arith.truncf %34 : vector<4x8x16xf32> to vector<4x8x16xbf16>
    %40 = arith.truncf %36 : vector<4x8x16xf32> to vector<4x8x16xbf16>
    "tpu.trace_start"() <{level = 10 : i32, message = "hpd,hqd->hpq"}> : () -> ()
    %cst_15 = arith.constant dense<0.000000e+00> : vector<4x8x8xf32>
    %41 = tpu.matmul %39, %40, %cst_15 {dimension_numbers = #tpu.dot_dimension_numbers<[2], [2], [1], [1], [0, 0, 0, 1, 1, 1], [0], [0]>} : vector<4x8x16xbf16>, vector<4x8x16xbf16>, vector<4x8x8xf32> -> vector<4x8x8xf32>
    "tpu.trace_stop"() : () -> ()
    %cst_16 = arith.constant dense<0xFF800000> : vector<4x8xf32>
    %42 = vector.multi_reduction <maximumf>, %41, %cst_16 [2] : vector<4x8x8xf32> to vector<4x8xf32>
    %43 = vector.shape_cast %42 : vector<4x8xf32> to vector<4x8x1xf32>
    %44 = vector.broadcast %43 : vector<4x8x1xf32> to vector<4x8x8xf32>
    %45 = arith.subf %41, %44 : vector<4x8x8xf32>
    %46 = math.exp %45 : vector<4x8x8xf32>
    %cst_17 = arith.constant dense<0.000000e+00> : vector<4x8xf32>
    %47 = vector.multi_reduction <add>, %46, %cst_17 [2] : vector<4x8x8xf32> to vector<4x8xf32>
    %48 = vector.shape_cast %47 : vector<4x8xf32> to vector<4x8x1xf32>
    %49 = tpu.reciprocal %48 {approx = true} : vector<4x8x1xf32> -> vector<4x8x1xf32>
    %50 = vector.broadcast %49 : vector<4x8x1xf32> to vector<4x8x8xf32>
    %51 = arith.mulf %46, %50 : vector<4x8x8xf32>
    %52 = arith.truncf %51 : vector<4x8x8xf32> to vector<4x8x8xbf16>
    %53 = arith.truncf %38 : vector<4x8x16xf32> to vector<4x8x16xbf16>
    "tpu.trace_start"() <{level = 10 : i32, message = "hpq,hqd->hpd"}> : () -> ()
    %cst_18 = arith.constant dense<0.000000e+00> : vector<4x8x16xf32>
    %54 = tpu.matmul %52, %53, %cst_18 {dimension_numbers = #tpu.dot_dimension_numbers<[2], [1], [1], [2], [0, 0, 0, 1, 1, 2], [0], [0]>} : vector<4x8x8xbf16>, vector<4x8x16xbf16>, vector<4x8x16xf32> -> vector<4x8x16xf32>
    "tpu.trace_stop"() : () -> ()
    %55 = vector.shape_cast %54 : vector<4x8x16xf32> to vector<1x4x8x16xf32>
    %56 = tpu.transpose %55, [0, 2, 1, 3] : vector<1x4x8x16xf32> -> vector<1x8x4x16xf32>
    %57 = vector.shape_cast %56 : vector<1x8x4x16xf32> to vector<8x64xf32>
    %58 = arith.truncf %57 : vector<8x64xf32> to vector<8x64xbf16>
    %c0_19 = arith.constant 0 : index
    %c0_20 = arith.constant 0 : index
    %59 = vector.load %arg6[%c0_19, %c0_20] : memref<64x128xbf16, #tpu.memory_space<vmem>>, vector<64x128xbf16>
    %cst_21 = arith.constant dense<0.000000e+00> : vector<8x128xf32>
    %60 = tpu.matmul %58, %59, %cst_21 {dimension_numbers = #tpu.dot_dimension_numbers<[1], [0], [0], [1], [0, 0, 1, 1], [], []>} : vector<8x64xbf16>, vector<64x128xbf16>, vector<8x128xf32> -> vector<8x128xf32>
    %c0_22 = arith.constant 0 : index
    %c0_23 = arith.constant 0 : index
    %61 = vector.load %arg7[%c0_22, %c0_23] : memref<1x128xf32, #tpu.memory_space<vmem>>, vector<1x128xf32>
    %62 = vector.broadcast %61 : vector<1x128xf32> to vector<8x128xf32>
    %63 = arith.addf %60, %62 : vector<8x128xf32>
    %64 = vector.shape_cast %63 : vector<8x128xf32> to vector<1x8x128xf32>
    %c0_24 = arith.constant 0 : index
    %c0_25 = arith.constant 0 : index
    %c0_26 = arith.constant 0 : index
    %65 = vector.load %arg8[%c0_24, %c0_25, %c0_26] : memref<1x8x128xf32, #tpu.memory_space<vmem>>, vector<1x8x128xf32>
    tpu.vector_store %arg8[%c0_24, %c0_25, %c0_26], %64 {strides = array<i32>} : memref<1x8x128xf32, #tpu.memory_space<vmem>>, vector<1x8x128xf32>,
    return
  }
  func.func @transform_0(%arg0: i32) -> (i32, i32, i32) {
    %c0_i32 = arith.constant 0 : i32
    %c0_i32_0 = arith.constant 0 : i32
    %c0_i32_1 = arith.constant 0 : i32
    return %arg0, %c0_i32, %c0_i32_0 : i32, i32, i32
  }
  func.func @transform_1(%arg0: i32) -> (i32, i32) {
    %c0_i32 = arith.constant 0 : i32
    %c0_i32_0 = arith.constant 0 : i32
    %c0_i32_1 = arith.constant 0 : i32
    return %c0_i32, %c0_i32_0 : i32, i32
  }
  func.func @transform_2(%arg0: i32) -> (i32, i32) {
    %c0_i32 = arith.constant 0 : i32
    %c0_i32_0 = arith.constant 0 : i32
    %c0_i32_1 = arith.constant 0 : i32
    return %c0_i32, %c0_i32_0 : i32, i32
  }
  func.func @transform_3(%arg0: i32) -> (i32, i32) {
    %c0_i32 = arith.constant 0 : i32
    %c0_i32_0 = arith.constant 0 : i32
    %c0_i32_1 = arith.constant 0 : i32
    return %c0_i32, %c0_i32_0 : i32, i32
  }
  func.func @transform_4(%arg0: i32) -> (i32, i32) {
    %c0_i32 = arith.constant 0 : i32
    %c0_i32_0 = arith.constant 0 : i32
    %c0_i32_1 = arith.constant 0 : i32
    return %c0_i32, %c0_i32_0 : i32, i32
  }
  func.func @transform_5(%arg0: i32) -> (i32, i32) {
    %c0_i32 = arith.constant 0 : i32
    %c0_i32_0 = arith.constant 0 : i32
    %c0_i32_1 = arith.constant 0 : i32
    return %c0_i32, %c0_i32_0 : i32, i32
  }
  func.func @transform_6(%arg0: i32) -> (i32, i32) {
    %c0_i32 = arith.constant 0 : i32
    %c0_i32_0 = arith.constant 0 : i32
    %c0_i32_1 = arith.constant 0 : i32
    return %c0_i32, %c0_i32_0 : i32, i32
  }
  func.func @transform_7(%arg0: i32) -> (i32, i32, i32) {
    %c0_i32 = arith.constant 0 : i32
    %c0_i32_0 = arith.constant 0 : i32
    %c0_i32_1 = arith.constant 0 : i32
    return %arg0, %c0_i32, %c0_i32_0 : i32, i32, i32
  }
}

</mosaic_0001>

<bundles_post_ra>
// kernel: tpu_custom_call.1
= control target key start
LH: loop header
LB: loop body
LE: loop exit
PB: predicated region body
PF: predicated region fallthrough
CT: control target
= control target key end

     0   :  { %12 = vsyncpa [#allocation3], 0  ;;  %s2531_s0 = inlined_call_operand.hbm [shape: f32[2,8,32], index: 0, kind: input, shape index: {}]   ;;  %s2532_s1 = inlined_call_operand.vmem [shape: f32[1,32], index: 1, kind: input, shape index: {}]   ;;  %s2533_s2 = inlined_call_operand.vmem [shape: f32[1,32], index: 2, kind: input, shape index: {}]   ;;  %s2534_s3 = inlined_call_operand.hbm [shape: bf16[32,256], index: 3, kind: input, shape index: {}]   ;;  %s2535_s4 = inlined_call_operand.vmem [shape: f32[1,256], index: 4, kind: input, shape index: {}]   ;;  %s2536_s5 = inlined_call_operand.hbm [shape: bf16[64,128], index: 5, kind: input, shape index: {}]   ;;  %s2537_s6 = inlined_call_operand.vmem [shape: f32[1,128], index: 6, kind: input, shape index: {}]   ;;  %s2538_s7 = inlined_call_operand.hbm [shape: f32[2,8,128], index: 7, kind: output, shape index: {}]  }
   0x1   :  { %14 = vsyncpa [#allocation3 + $0x1], 0 }
   0x2   :  { %15 = vsyncpa [#allocation6], 0 }
   0x3   :  { %16 = vsyncpa [#allocation4], 0 }
   0x4   :  { %18 = vsyncpa [#allocation4 + $0x1], 0  ;;  %s2107_s24 = smov 0   ;;  %s2109_s25 = smov 0  }
   0x5   :  { %s2111_s26 = smov 0   ;;  %s2113_s27 = smov 0  }
   0x6 LB: > { %s2128_s28 = sadd.s32 4294967295, %s2045_s27   ;;  %s1648_s29 = sadd.s32 4294967294, %s2045_s27   ;;  %s2045_s27 = sphi %s2113_s27, %s2558_s27   ;;  %s2041_s26 = sphi %s2111_s26, %s2557_s26   ;;  %s2037_s25 = sphi %s2109_s25, %s2556_s25   ;;  %s2033_s24 = sphi %s2107_s24, %s2555_s24  }
   0x7   : > { %p44_p0 = scmp.ne.s32.totalorder %s2037_s25, %s2033_s24  ;;  %p2539_p1 = scmp.eq.s32.totalorder %s2128_s28, 0 }
   0x8   : > { %p200_p3 = scmp.eq.s32.totalorder %s1648_s29, 1  ;;  %p1649_p5 = scmp.ge.s32.totalorder %s2045_s27, 1 }
   0x9   : > { %p2137_p4 = por %p2539_p1, %p44_p0  ;;  %p207_p7 = scmp.lt.s32.totalorder %s2045_s27, 3 }
   0xa   : > { %p2142_p6 = por %p200_p3, %p44_p0  ;;  %s2047_s10 = smov [#allocation5]  }
   0xb   : > { %s2542_s30 = scalar_select %p2137_p4, 1, 0 }
   0xc   : > { %s2543_s8 = scalar_select %p2142_p6, 1, 0 }
   0xd   : > { %p2147_p8 = pnand %p1649_p5, %p207_p7  ;;  %s225_s11 = sshll.u32 %s2047_s10, 4  ;;  %s2151_s11 = int_to_ptr.vmem [resolvable:$true] %s225_s11 }
   0xe   : > { %s2048_s13 = smov [#allocation7]   ;;  %s1889_s17 = scalar_lea.hbm %s2534_s3, 512 }
   0xf   : > { %p1790_p9 = pneg %p2147_p8  ;;  %s241_s14 = sshll.u32 %s2048_s13, 4  ;;  %s2162_s14 = int_to_ptr.vmem [resolvable:$true] %s241_s14 }
  0x10   : > { %p1890_p12 = scmp.ne.s32.totalorder %s2534_s3, %s1889_s17  ;;  %p1896_p5 = scmp.lt.u32.totalorder %s1889_s17, %s2534_s3 }
  0x11   : > { %p2158_p11 = pnand %p1790_p9, %p2539_p1 }
  0x13   : > { %p1891_p13 = pneg %p2158_p11 }
  0x15   : > { %p1892_p0 = pnand %p1891_p13, %p1890_p12 }
  0x17   : > { %p1893_p3 = pneg %p1892_p0 }
  0x19   : > { %p1898_p7 = pnand %p1896_p5, %p1893_p3 }
  0x1b   : > { %1901 = shalt.err (!%p1898_p7)
}
  0x1c   : > { %s1902_s22 = scalar_lea.vmem %s2151_s11, 512  ;;  %p1910_p2 = scmp.lt.s32.totalorder %s2151_s11, %s2151_s11 }
  0x1d   : > { %p1903_p9 = scmp.ne.s32.totalorder %s2151_s11, %s1902_s22  ;;  %p1911_p12 = scmp.lt.s32.totalorder %s1902_s22, %s1902_s22 }
  0x1f   : > { %p1905_p10 = pnand %p1903_p9, %p1891_p13  ;;  %p1912_p0 = por %p1911_p12, %p1910_p2 }
  0x21   : > { %p1906_p1 = pneg %p1905_p10 }
  0x23   : > { %p1913_p6 = pnand %p1912_p0, %p1906_p1 }
  0x25   : > { %1916 = shalt.err (!%p1913_p6)
}
  0x26   : > { %s2049_s23 = smov 128   ;;  %s2050_s29 = smov 8  }
  0x27   : > { %1793 = dma.hbm_to_vmem [thread:$0]  (!%p2158_p11), %s2534_s3, 512, %s2151_s11, [#allocation6], %s2049_s23, %s2049_s23, %s2050_s29  }
  0x28   : > { %s1917_s17 = scalar_lea.hbm %s2536_s5, 512 }
  0x29   : > { %p1918_p2 = scmp.ne.s32.totalorder %s2536_s5, %s1917_s17  ;;  %p1924_p10 = scmp.lt.u32.totalorder %s1917_s17, %s2536_s5 }
  0x2b   : > { %p1920_p1 = pnand %p1918_p2, %p1891_p13 }
  0x2d   : > { %p1921_p6 = pneg %p1920_p1 }
  0x2f   : > { %p1926_p3 = pnand %p1924_p10, %p1921_p6 }
  0x31   : > { %1929 = shalt.err (!%p1926_p3)
}
  0x32   : > { %s1930_s11 = scalar_lea.vmem %s2162_s14, 512  ;;  %p1938_p12 = scmp.lt.s32.totalorder %s2162_s14, %s2162_s14 }
  0x33   : > { %p1931_p5 = scmp.ne.s32.totalorder %s2162_s14, %s1930_s11  ;;  %p1939_p0 = scmp.lt.s32.totalorder %s1930_s11, %s1930_s11 }
  0x35   : > { %p1933_p7 = pnand %p1931_p5, %p1891_p13  ;;  %p1940_p2 = por %p1939_p0, %p1938_p12 }
  0x37   : > { %p1934_p9 = pneg %p1933_p7 }
  0x39   : > { %p1941_p1 = pnand %p1940_p2, %p1934_p9 }
  0x3b   : > { %1944 = shalt.err (!%p1941_p1)
}
  0x3c   : > { %s2051_s22 = smov 64   ;;  %s2052_s23 = smov 4  }
  0x3d   : > { %1796 = dma.hbm_to_vmem [thread:$0]  (!%p2158_p11), %s2536_s5, 512, %s2162_s14, [#allocation6], %s2051_s22, %s2051_s22, %s2052_s23  }
  0x3e   : > { %s2217_s13 = sadd.s32 1, %s2045_s27   ;;  %s31_s16 = sadd.s32 1, %s2041_s26 }
  0x3f   : > { %s28_s15 = ssub.s32 %s2045_s27, %s2217_s13  ;;  %p38_p6 = scmp.ne.s32.totalorder %s2041_s26, %s2037_s25 }
  0x40   : > { %p29_p13 = scmp.eq.s32.totalorder %s28_s15, 0  ;;  %p39_p10 = scmp.eq.s32.totalorder %s2045_s27, 0 }
  0x41   : > { %p2546_p5 = scmp.eq.s32.totalorder %s2128_s28, 1  ;;  %p1807_p9 = scmp.lt.s32.totalorder %s2045_s27, 2 }
  0x42   : > { %s2226_s17 = scalar_select %p29_p13, %s2041_s26, %s31_s16  }
  0x43   : > { %p40_p3 = por %p39_p10, %p38_p6  ;;  %p2230_p7 = por %p2546_p5, %p38_p6 }
  0x44   : > { %s258_s12 = sand.u32 1, %s2041_s26   ;;  %s1654_s14 = sshll.u32 %s2045_s27, 7 }
  0x45   : > { %s2547_s18 = scalar_select %p2230_p7, 1, 0 }
  0x46   : > { %s1653_s19 = sshll.u32 %s258_s12, 3  ;;  %s2240_s11 = scalar_lea.hbm %s2531_s0, %s1654_s14 }
  0x47   : > { %s262_s22 = scalar_lea.vmem [#allocation2], %s1653_s19  ;;  %p2244_p11 = pnand %p1807_p9, %p40_p3 }
  0x48   : > { %s269_s23 = sshll.u32 %s262_s22, 4  ;;  %s259_s10 = scalar_lea.sflag [#allocation3], %s258_s12  ;;  %s2242_s23 = int_to_ptr.vmem [resolvable:$true] %s269_s23 }
  0x49   : > { %s1945_s15 = scalar_lea.hbm %s2240_s11, 128  ;;  %p1947_p0 = pneg %p2244_p11 }
  0x4a   : > { %p1946_p12 = scmp.ne.s32.totalorder %s2240_s11, %s1945_s15  ;;  %s1950_s14 = scalar_lea.hbm %s2531_s0, 256 }
  0x4b   : > { %p1951_p13 = scmp.lt.u32.totalorder %s2240_s11, %s2531_s0  ;;  %p1952_p6 = scmp.lt.u32.totalorder %s1950_s14, %s1945_s15 }
  0x4c   : > { %p1948_p2 = pnand %p1947_p0, %p1946_p12  ;;  %p1954_p3 = scmp.lt.u32.totalorder %s1945_s15, %s2240_s11 }
  0x4d   : > { %p1953_p10 = por %p1952_p6, %p1951_p13 }
  0x4e   : > { %p1949_p1 = pneg %p1948_p2 }
  0x4f   : > { %p1955_p5 = por %p1954_p3, %p1953_p10 }
  0x51   : > { %p1956_p9 = pnand %p1955_p5, %p1949_p1 }
  0x53   : > { %1959 = shalt.err (!%p1956_p9)
}
  0x54   : > { %s1960_s12 = scalar_lea.vmem %s2242_s23, 128  ;;  %s2053_s22 = smov [#allocation2]  }
  0x55   : > { %p1961_p12 = scmp.ne.s32.totalorder %s2242_s23, %s1960_s12  ;;  %s1965_s16 = sshll.u32 %s2053_s22, 4  ;;  %s1966_s16 = int_to_ptr.vmem [resolvable:$false] %s1965_s16 }
  0x56   : > { %s1967_s19 = scalar_lea.vmem %s1966_s16, 256  ;;  %p1968_p4 = scmp.lt.s32.totalorder %s2242_s23, %s1966_s16 }
  0x57   : > { %p1963_p2 = pnand %p1961_p12, %p1947_p0  ;;  %p1969_p13 = scmp.lt.s32.totalorder %s1967_s19, %s1960_s12 }
  0x59   : > { %p1964_p7 = pneg %p1963_p2  ;;  %p1970_p6 = por %p1969_p13, %p1968_p4 }
  0x5b   : > { %p1971_p10 = pnand %p1970_p6, %p1964_p7 }
  0x5d   : > { %1974 = shalt.err (!%p1971_p10)
}
  0x5e   : > { %1800 = dma.hbm_to_vmem [thread:$0]  (!%p2244_p11), %s2240_s11, 128, %s2242_s23, %s259_s10  }
  0x5f   : > { %278 = sbr.rel (%p2147_p8) target bundleno = 1953 (0x7a1), region = 48  ;;  %s2276_s15 = sand.u32 (!%p2147_p8), 1, %s2037_s25  }
  0x60   : > { %s1656_s14 = sshll.u32 (!%p2147_p8), %s2276_s15, 3  ;;  %s281_s20 = scalar_lea.sflag (!%p2147_p8), [#allocation3], %s2276_s15 }
  0x61   : > { %s284_s21 = scalar_lea.vmem (!%p2147_p8), [#allocation2], %s1656_s14  ;;  %p2549_p4 = scmp.ne.s32.totalorder (!%p2147_p8), %s2542_s30, 0 }
  0x66   : > { %2020 = dma.done.wait (%p2549_p4), %s281_s20, 128  }
  0x67   : > { %2022 = vsyncadd (%p2549_p4), %s281_s20, 4294967168  ;;  %p2550_p7 = scmp.eq.s32.totalorder %s2128_s28, 0 }
  0x69   : > { %2024 = dma.done.wait (%p2550_p7), [#allocation6], 1024   ;;  %p2551_p8 = pmov %p2550_p7 }
  0x6a   : > { %vm325_vm0 = vcmask 261120   ;;  %v324_v0 = vld [vmem:[%s284_s21] sm:$0xff]  ;;  %v1861_v7 = vld [vmem:[#allocation5 + $0x4] ss:$8 sps:$4 sm:$0xff]   ;;  %v1863_v8 = vld [vmem:[#allocation5] ss:$8 sps:$4 sm:$0xff]   ;;  %v363_v22 = vlaneseq }
  0x6b   : > { %2026 = vsyncadd (%p2551_p8), [#allocation6], 4294966272  ;;  %v326_v1 = vsel %vm325_vm0, %v324_v0, 0.0  ;;  %v1864_v9 = vld [vmem:[#allocation5 + $0x14] ss:$8 sps:$4 sm:$0xff]   ;;  %396 = vmatprep.subr.bf16.mxu0 %v1861_v7  ;;  %v2054_v10 = vmov 0  }
  0x6c   : > { %327 = vadd.xlane.f32.xlu0 %v326_v1  ;;  %428 = vmatprep.mubr.bf16.mxu0 %v2054_v10  ;;  %v1866_v11 = vld [vmem:[#allocation5 + $0x10] ss:$8 sps:$4 sm:$0xff]   ;;  %v2299_v23 = vshrl.u32 %v363_v22, 7  ;;  %s2055_s12 = smov 32   ;;  %s2056_s22 = smov 64   ;;  %v2061_v32 = vmov 0.0  }
  0x6d   : > { %397 = vmatpush1.bf16.msra.mxu0 %v1863_v8  ;;  %v1660_v16 = vld [vmem:[%s2532_s1] ss:$0 sm:$0xff]  ;;  %s2057_s16 = smov 48   ;;  %s2058_s19 = smov 16   ;;  %1718 = vmatprep.subr.bf16.mxu1 %v2061_v32  ;;  %vm2063_vm1 = vmmov 0   ;;  %vm885_vm2 = vcmask 130048  }
  0x6e   : > { %398 = vmatprep.subr.bf16.mxu0 %v1864_v9  ;;  %v1661_v18 = vld [vmem:[%s2533_s2] ss:$0 sm:$0xff]  ;;  %v365_v24 = vsub.s32 0, %v2299_v23  ;;  %s2059_s20 = smov 112   ;;  %s2060_s21 = smov 96   ;;  %1720 = vmatprep.mubr.msk.bf16.mxu1 %vm2063_vm1, %v2061_v32  ;;  %vm1070_vm3 = vcmask 64512  }
  0x6f   : > { %v2305_v25 = vld [vmem:[%s2535_s4] sm:$0x3]  ;;  %s2062_s30 = smov 80   ;;  %v2064_v33 = vmov 1983009808   ;;  %vm1126_vm4 = vcmask 1043456  }
  0x70   : > { %v366_v26 = vrot.slane %v2305_v25, %v365_v24  ;;  %v472_v34 = vunpack.c.l.s4 %v2064_v33  ;;  %v2065_v36 = vmov 1934713408   ;;  %vm1458_vm5 = vcmask 392192   ;;  %s1694_s23 = sshll.u32 %s2128_s28, 7  ;;  %s322_s29 = scalar_lea.vmem [#allocation8], %s1656_s14 }
  0x71   : > { %399 = vmatpush1.bf16.msra.mxu0 %v1866_v11  ;;  %v536_v37 = vunpack.c.l.s4 %v2065_v36  ;;  %vm1500_vm6 = vcmask 523264   ;;  %s1559_s10 = sshll.u32 %s322_s29, 4  ;;  %s1546_s28 = scalar_lea.sflag [#allocation4], %s2276_s15  ;;  %s2489_s10 = int_to_ptr.vmem [resolvable:$true] %s1559_s10 }
  0x72   : > { %1724 = vmatprep.subr.bf16.mxu0 %v2061_v32  ;;  %v473_v38 = vunpack.c.0.s8 %v472_v34  ;;  %p2552_p0 = scmp.ne.s32.totalorder %s2547_s18, 0  ;;  %s2066_s14 = smov [#allocation8]  }
  0x73   : > { %v537_v41 = vunpack.c.0.s8 %v536_v37 }
  0x74   : > { %v2332_v42 = vsub.s32 %v473_v38, %v2299_v23 }
  0x75   : > { %v2335_v48 = vsub.s32 %v537_v41, %v2299_v23 }
  0xf9   : > { %v328_v2 = vpop.xlane.xlu0 %327 }
  0xfa   : > { %v330_v3 = vmul.f32 0.03125, %v328_v2 }
  0xfc   : > { %v331_v4 = vsub.f32 %v324_v0, %v330_v3 }
  0xfe   : > { %v332_v5 = vmul.f32 %v331_v4, %v331_v4 }
 0x100   : > { %v333_v6 = vsel %vm325_vm0, %v332_v5, 0.0 }
 0x101   : > { %334 = vadd.xlane.f32.xlu0 %v333_v6 }
 0x18e   : > { %v335_v12 = vpop.xlane.xlu0 %334 }
 0x18f   : > { %v336_v13 = vmul.f32 0.03125, %v335_v12 }
 0x191   : > { %v337_v14 = vadd.f32 1e-05, %v336_v13 }
 0x193   : > { %1871 = vrsqrt.f32 %v337_v14 }
 0x19d   : > { %v1872_v15 = vpop.eup %1871 }
 0x19e   : > { %v339_v17 = vmul.f32 %v1872_v15, %v331_v4 }
 0x1a0   : > { %v347_v19 = vmul.f32 %v1660_v16, %v339_v17 }
 0x1a2   : > { %v355_v20 = vadd.f32 %v1661_v18, %v347_v19 }
 0x1a4   : > { %v356_v21 = vpack.c.bf16 %v355_v20, %v355_v20 }
 0x1a6   : > { %1666 = vmatmul.mubr.msk.bf16.vlgmr.msra.gmra.mrb[0].mxu0 %vm325_vm0, %v356_v21 }
 0x1a7   : > { %1726 = vmatprep.mubr.msk.bf16.mxu0 %vm2063_vm1, %v2061_v32 }
 0x279   : > { %v430_v27 = vpop.f32.mrb[0].mxu0 }
 0x27a   : > { %v2308_v28 = vadd.f32 %v430_v27, %v366_v26  ;;  %v2310_v29 = vpop.f32.mrb[1].mxu0 }
 0x27b   : > { %v434_v30 = vpop.f32.mrb[2].mxu0 }
 0x27c   : > { %v435_v31 = vpop.f32.mrb[3].mxu0  ;;  %453 = vrot.lane.b32.xlu0 %v2308_v28, %s2055_s12  ;;  %447 = vrot.lane.b32.xlu1 %v2308_v28, %s2056_s22 }
 0x280   : > { %450 = vrot.lane.b32.xlu1 %v2308_v28, %s2057_s16 }
 0x284   : > { %456 = vrot.lane.b32.xlu1 %v2308_v28, %s2058_s19 }
 0x288   : > { %438 = vrot.lane.b32.xlu1 %v2308_v28, %s2059_s20 }
 0x28c   : > { %441 = vrot.lane.b32.xlu1 %v2308_v28, %s2060_s21 }
 0x290   : > { %444 = vrot.lane.b32.xlu1 %v2308_v28, %s2062_s30 }
 0x2ee   : > { %v448_v35 = vpop.permute.xlu1 %447  ;;  %v454_v39 = vpop.permute.xlu0 %453 }
 0x2ef   : > { %v501_v43 = vcombine.low %v448_v35, %v454_v39  ;;  %v502_v44 = vcombine.high %v448_v35, %v454_v39 }
 0x2f1   : > { %v509_v49 = vrot.slane %v501_v43, %v2332_v42  ;;  %v516_v50 = vrot.slane %v502_v44, %v2332_v42 }
 0x2f2   : > { %v451_v40 = vpop.permute.xlu1 %450 }
 0x2f6   : > { %v457_v45 = vpop.permute.xlu1 %456 }
 0x2f7   : > { %v517_v46 = vcombine.low %v451_v40, %v457_v45  ;;  %v518_v47 = vcombine.high %v451_v40, %v457_v45 }
 0x2f9   : > { %v525_v51 = vrot.slane %v517_v46, %v2332_v42  ;;  %v532_v52 = vrot.slane %v518_v47, %v2332_v42 }
 0x2fa   : > { %v439_v53 = vpop.permute.xlu1 %438 }
 0x2fb   : > { %v565_v54 = vcombine.low %v509_v49, %v525_v51  ;;  %v566_v55 = vcombine.high %v509_v49, %v525_v51  ;;  %v581_v56 = vcombine.low %v516_v50, %v532_v52  ;;  %v582_v57 = vcombine.high %v516_v50, %v532_v52 }
 0x2fd   : > { %v573_v58 = vrot.slane %v565_v54, %v2335_v48  ;;  %v580_v59 = vrot.slane %v566_v55, %v2335_v48  ;;  %v589_v60 = vrot.slane %v581_v56, %v2335_v48  ;;  %v596_v61 = vrot.slane %v582_v57, %v2335_v48 }
 0x2fe   : > { %v442_v62 = vpop.permute.xlu1 %441 }
 0x2ff   : > { %v1668_v63 = vcombine.low %v573_v58, %v580_v59  ;;  %v1670_v0 = vcombine.high %v573_v58, %v580_v59  ;;  %v1672_v1 = vcombine.low %v589_v60, %v596_v61  ;;  %v1674_v2 = vcombine.high %v589_v60, %v596_v61 }
 0x300   : > { %v469_v3 = vcombine.low %v2308_v28, %v442_v62  ;;  %v470_v4 = vcombine.high %v2308_v28, %v442_v62 }
 0x301   : > { %v688_v5 = vrot.slane %v1668_v63, %v2332_v42  ;;  %v704_v6 = vrot.slane %v1670_v0, %v2332_v42  ;;  %v720_v7 = vrot.slane %v1672_v1, %v2332_v42  ;;  %v736_v8 = vrot.slane %v1674_v2, %v2332_v42 }
 0x302   : > { %v445_v9 = vpop.permute.xlu1 %444  ;;  %v477_v14 = vrot.slane %v469_v3, %v2332_v42  ;;  %v484_v15 = vrot.slane %v470_v4, %v2332_v42 }
 0x303   : > { %v485_v10 = vcombine.low %v439_v53, %v445_v9  ;;  %v486_v11 = vcombine.high %v439_v53, %v445_v9  ;;  %v753_v12 = vcombine.low %v688_v5, %v704_v6  ;;  %v785_v13 = vcombine.low %v720_v7, %v736_v8 }
 0x304   : > { %v754_v20 = vcombine.high %v688_v5, %v704_v6  ;;  %v786_v21 = vcombine.high %v720_v7, %v736_v8 }
 0x305   : > { %v493_v16 = vrot.slane %v485_v10, %v2332_v42  ;;  %v500_v17 = vrot.slane %v486_v11, %v2332_v42  ;;  %v761_v18 = vrot.slane %v753_v12, %v2335_v48  ;;  %v793_v19 = vrot.slane %v785_v13, %v2335_v48 }
 0x306   : > { %v768_v38 = vrot.slane %v754_v20, %v2335_v48  ;;  %v800_v39 = vrot.slane %v786_v21, %v2335_v48 }
 0x307   : > { %v533_v22 = vcombine.low %v477_v14, %v493_v16  ;;  %v534_v24 = vcombine.high %v477_v14, %v493_v16  ;;  %v549_v26 = vcombine.low %v484_v15, %v500_v17  ;;  %v550_v27 = vcombine.high %v484_v15, %v500_v17 }
 0x308   : > { %v805_v28 = vcombine.low %v761_v18, %v793_v19  ;;  %v806_v30 = vcombine.high %v761_v18, %v793_v19  ;;  %v807_v54 = vcombine.low %v768_v38, %v800_v39  ;;  %v808_v55 = vcombine.high %v768_v38, %v800_v39 }
 0x309   : > { %v541_v31 = vrot.slane %v533_v22, %v2335_v48  ;;  %v548_v33 = vrot.slane %v534_v24, %v2335_v48  ;;  %v557_v34 = vrot.slane %v549_v26, %v2335_v48  ;;  %v564_v35 = vrot.slane %v550_v27, %v2335_v48 }
 0x30a   : > { %v881_v36 = vpack.c.bf16 %v805_v28, %v805_v28  ;;  %v882_v37 = vpack.c.bf16 %v806_v30, %v806_v30  ;;  %v883_v62 = vpack.c.bf16 %v807_v54, %v807_v54  ;;  %v884_v63 = vpack.c.bf16 %v808_v55, %v808_v55 }
 0x30b   : > { %v1667_v40 = vcombine.low %v541_v31, %v548_v33  ;;  %v1669_v41 = vcombine.high %v541_v31, %v548_v33  ;;  %v1671_v43 = vcombine.low %v557_v34, %v564_v35  ;;  %v1673_v44 = vcombine.high %v557_v34, %v564_v35 }
 0x30c   : > { %v890_v45 = vsel %vm885_vm2, %v881_v36, 0  ;;  %v936_v46 = vsel %vm885_vm2, %v882_v37, 0  ;;  %v982_v4 = vsel %vm885_vm2, %v883_v62, 0  ;;  %v1028_v5 = vsel %vm885_vm2, %v884_v63, 0 }
 0x30d   : > { %v681_v47 = vrot.slane %v1667_v40, %v2332_v42  ;;  %v697_v49 = vrot.slane %v1669_v41, %v2332_v42  ;;  %v713_v50 = vrot.slane %v1671_v43, %v2332_v42  ;;  %v729_v51 = vrot.slane %v1673_v44, %v2332_v42  ;;  %1719 = vmatpush3.bf16.xpose.msra.mxu1 %v890_v45 }
 0x30e   : > { %1725 = vmatpush3.bf16.xpose.msra.mxu0 %v936_v46  ;;  %1730 = vmatprep.subr.bf16.mxu1 %v2061_v32  ;;  %v369_v34 = vsub.s32 1, %v2299_v23 }
 0x30f   : > { %1736 = vmatprep.subr.bf16.mxu0 %v2061_v32  ;;  %v737_v52 = vcombine.low %v681_v47, %v697_v49  ;;  %v769_v53 = vcombine.low %v713_v50, %v729_v51  ;;  %v738_v56 = vcombine.high %v681_v47, %v697_v49  ;;  %v770_v57 = vcombine.high %v713_v50, %v729_v51 }
 0x310   : > { %v370_v35 = vrot.slane %v2305_v25, %v369_v34 }
 0x311   : > { %v745_v58 = vrot.slane %v737_v52, %v2335_v48  ;;  %v777_v59 = vrot.slane %v769_v53, %v2335_v48  ;;  %v752_v2 = vrot.slane %v738_v56, %v2335_v48  ;;  %v784_v3 = vrot.slane %v770_v57, %v2335_v48 }
 0x312   : > { %v433_v36 = vadd.f32 %v2310_v29, %v370_v35 }
 0x313   : > { %v801_v60 = vcombine.low %v745_v58, %v777_v59  ;;  %v802_v61 = vcombine.high %v745_v58, %v777_v59  ;;  %v803_v6 = vcombine.low %v752_v2, %v784_v3  ;;  %v804_v7 = vcombine.high %v752_v2, %v784_v3 }
 0x315   : > { %v877_v0 = vpack.c.bf16 %v801_v60, %v801_v60  ;;  %v878_v1 = vpack.c.bf16 %v802_v61, %v802_v61  ;;  %v879_v8 = vpack.c.bf16 %v803_v6, %v803_v6  ;;  %v880_v9 = vpack.c.bf16 %v804_v7, %v804_v7 }
 0x317   : > { %1721 = vmatmul.mubr.msk.bf16.vlgmr.msra.gmra.mrb[0].mxu1 %vm885_vm2, %v877_v0  ;;  %1727 = vmatmul.mubr.msk.bf16.vlgmr.msra.gmra.mrb[4].mxu0 %vm885_vm2, %v878_v1 }
 0x318   : > { %1731 = vmatpush3.bf16.xpose.msra.mxu1 %v982_v4  ;;  %1737 = vmatpush3.bf16.xpose.msra.mxu0 %v1028_v5 }
 0x319   : > { %1732 = vmatprep.mubr.msk.bf16.mxu1 %vm2063_vm1, %v2061_v32  ;;  %1738 = vmatprep.mubr.msk.bf16.mxu0 %vm2063_vm1, %v2061_v32 }
 0x31a   : > { %1742 = vmatprep.subr.bf16.mxu1 %v2061_v32  ;;  %1748 = vmatprep.subr.bf16.mxu0 %v2061_v32 }
 0x31f   : > { %1733 = vmatmul.mubr.msk.bf16.vlgmr.msra.gmra.mrb[4].mxu1 %vm885_vm2, %v879_v8  ;;  %1739 = vmatmul.mubr.msk.bf16.vlgmr.msra.gmra.mrb[8].mxu0 %vm885_vm2, %v880_v9 }
 0x320   : > { %1744 = vmatprep.mubr.msk.bf16.mxu1 %vm2063_vm1, %v2061_v32  ;;  %1750 = vmatprep.mubr.msk.bf16.mxu0 %vm2063_vm1, %v2061_v32 }
 0x3ea   : > { %v926_v10 = vpop.f32.mrb[0].mxu1  ;;  %v972_v11 = vpop.f32.mrb[4].mxu0 }
 0x3eb   : > { %v1722_v12 = vpop.f32.mrb[1].mxu1  ;;  %v1728_v13 = vpop.f32.mrb[5].mxu0  ;;  %v1074_v14 = vsel %vm1070_vm3, %v972_v11, -inf  ;;  %v1071_v15 = vsel %vm1070_vm3, %v926_v10, -inf }
 0x3ec   : > { %1075 = vmax.xlane.f32.xlu0 %v1074_v14  ;;  %v975_v16 = vpop.f32.mrb[6].mxu0  ;;  %1072 = vmax.xlane.f32.xlu1 %v1071_v15  ;;  %v929_v17 = vpop.f32.mrb[2].mxu1 }
 0x3ed   : > { %v1723_v18 = vpop.f32.mrb[3].mxu1  ;;  %v1729_v19 = vpop.f32.mrb[7].mxu0 }
 0x3f2   : > { %v1018_v20 = vpop.f32.mrb[4].mxu1  ;;  %v1064_v21 = vpop.f32.mrb[8].mxu0 }
 0x3f3   : > { %v1734_v22 = vpop.f32.mrb[5].mxu1  ;;  %v1740_v24 = vpop.f32.mrb[9].mxu0  ;;  %v1080_v26 = vsel %vm1070_vm3, %v1064_v21, -inf  ;;  %v1077_v27 = vsel %vm1070_vm3, %v1018_v20, -inf }
 0x3f4   : > { %1081 = vmax.xlane.f32.xlu0 %v1080_v26  ;;  %v1067_v28 = vpop.f32.mrb[10].mxu0  ;;  %1078 = vmax.xlane.f32.xlu1 %v1077_v27  ;;  %v1021_v30 = vpop.f32.mrb[6].mxu1 }
 0x3f5   : > { %v1735_v31 = vpop.f32.mrb[7].mxu1  ;;  %v1741_v33 = vpop.f32.mrb[11].mxu0 }
 0x405   : > { %460 = vrot.lane.b32.xlu1 %v433_v36, %s2059_s20  ;;  %s1979_s20 = sshll.u32 %s2066_s14, 4  ;;  %s1980_s20 = int_to_ptr.vmem [resolvable:$false] %s1979_s20 }
 0x406   : > { %p1982_p5 = scmp.lt.s32.totalorder %s2489_s10, %s1980_s20 }
 0x479   : > { %v1076_v37 = vpop.xlane.xlu0 %1075  ;;  %v1073_v38 = vpop.xlane.xlu1 %1072 }
 0x47a   : > { %v1084_v39 = vsub.f32 %v972_v11, %v1076_v37  ;;  %v1083_v40 = vsub.f32 %v926_v10, %v1073_v38 }
 0x47c   : > { %v1089_v41 = vmul.f32 1.442695, %v1084_v39  ;;  %v1087_v43 = vmul.f32 1.442695, %v1083_v40 }
 0x47e   : > { %1873 = vpow2.f32 %v1089_v41 }
 0x47f   : > { %1875 = vpow2.f32 %v1087_v43 }
 0x481   : > { %v1082_v29 = vpop.xlane.xlu0 %1081  ;;  %v1079_v46 = vpop.xlane.xlu1 %1078 }
 0x482   : > { %v1086_v47 = vsub.f32 %v1064_v21, %v1082_v29  ;;  %v1085_v49 = vsub.f32 %v1018_v20, %v1079_v46 }
 0x484   : > { %v1093_v50 = vmul.f32 1.442695, %v1086_v47  ;;  %v1091_v51 = vmul.f32 1.442695, %v1085_v49 }
 0x485   : > { %v461_v56 = vpop.permute.xlu1 %460 }
 0x486   : > { %1877 = vpow2.f32 %v1093_v50 }
 0x487   : > { %1879 = vpow2.f32 %v1091_v51 }
 0x488   : > { %v2399_v44 = vpop.eup %1873 }
 0x489   : > { %v2401_v45 = vpop.eup %1875  ;;  %v1098_v23 = vsel %vm1070_vm3, %v2399_v44, 0.0 }
 0x48a   : > { %1099 = vadd.xlane.f32.xlu0 %v1098_v23  ;;  %v1095_v25 = vsel %vm1070_vm3, %v2401_v45, 0.0 }
 0x48b   : > { %1096 = vadd.xlane.f32.xlu1 %v1095_v25 }
 0x490   : > { %v2409_v52 = vpop.eup %1877 }
 0x491   : > { %v2411_v53 = vpop.eup %1879  ;;  %v1104_v54 = vsel %vm1070_vm3, %v2409_v52, 0.0 }
 0x492   : > { %v1101_v55 = vsel %vm1070_vm3, %v2411_v53, 0.0 }
 0x49c   : > { %466 = vrot.lane.b32.xlu1 %v433_v36, %s2062_s30 }
 0x4a0   : > { %463 = vrot.lane.b32.xlu0 %v433_v36, %s2060_s21  ;;  %s1981_s21 = scalar_lea.vmem %s1980_s20, 256 }
 0x4bf   : > { %1105 = vadd.xlane.f32.xlu0 %v1104_v54 }
 0x4c0   : > { %1102 = vadd.xlane.f32.xlu1 %v1101_v55 }
 0x517   : > { %v1100_v57 = vpop.xlane.xlu0 %1099 }
 0x518   : > { %v1097_v58 = vpop.xlane.xlu1 %1096  ;;  %1881 = vrcp.f32 %v1100_v57 }
 0x519   : > { %1883 = vrcp.f32 %v1097_v58 }
 0x51b   : > { %v464_v59 = vpop.permute.xlu0 %463 }
 0x51c   : > { %v605_v60 = vcombine.low %v433_v36, %v464_v59  ;;  %v606_v61 = vcombine.high %v433_v36, %v464_v59  ;;  %v467_v62 = vpop.permute.xlu1 %466 }
 0x51d   : > { %v621_v63 = vcombine.low %v461_v56, %v467_v62  ;;  %v622_v0 = vcombine.high %v461_v56, %v467_v62 }
 0x51e   : > { %v613_v1 = vrot.slane %v605_v60, %v2332_v42  ;;  %v620_v2 = vrot.slane %v606_v61, %v2332_v42  ;;  %v1867_v60 = vld [vmem:[#allocation7] sm:$0xff]   ;;  %v1868_v61 = vld [vmem:[#allocation7 + $0x8] sm:$0xff]  }
 0x51f   : > { %v629_v3 = vrot.slane %v621_v63, %v2332_v42  ;;  %v636_v4 = vrot.slane %v622_v0, %v2332_v42 }
 0x521   : > { %v637_v5 = vcombine.low %v613_v1, %v629_v3  ;;  %v638_v6 = vcombine.high %v613_v1, %v629_v3  ;;  %v653_v7 = vcombine.low %v620_v2, %v636_v4  ;;  %v654_v8 = vcombine.high %v620_v2, %v636_v4 }
 0x522   : > { %v1882_v30 = vpop.eup %1881 }
 0x523   : > { %v645_v9 = vrot.slane %v637_v5, %v2335_v48  ;;  %v652_v10 = vrot.slane %v638_v6, %v2335_v48  ;;  %v661_v11 = vrot.slane %v653_v7, %v2335_v48  ;;  %v668_v12 = vrot.slane %v654_v8, %v2335_v48  ;;  %v1884_v34 = vpop.eup %1883 }
 0x524   : > { %v1112_v39 = vmul.f32 %v1882_v30, %v2399_v44  ;;  %v1111_v40 = vmul.f32 %v1884_v34, %v2401_v45 }
 0x525   : > { %v809_v13 = vcombine.low %v645_v9, %v652_v10  ;;  %v1675_v14 = vcombine.high %v645_v9, %v652_v10  ;;  %v825_v15 = vcombine.low %v661_v11, %v668_v12  ;;  %v1676_v16 = vcombine.high %v661_v11, %v668_v12 }
 0x526   : > { %v1115_v47 = vpack.c.bf16 %v1111_v40, %v1111_v40  ;;  %v1116_v49 = vpack.c.bf16 %v1112_v39, %v1112_v39 }
 0x527   : > { %v816_v17 = vrot.slane %v809_v13, %v2332_v42  ;;  %v824_v18 = vrot.slane %v1675_v14, %v2332_v42  ;;  %v832_v19 = vrot.slane %v825_v15, %v2332_v42  ;;  %v840_v20 = vrot.slane %v1676_v16, %v2332_v42 }
 0x529   : > { %v841_v21 = vcombine.low %v816_v17, %v824_v18  ;;  %v842_v22 = vcombine.high %v816_v17, %v824_v18  ;;  %v857_v24 = vcombine.low %v832_v19, %v840_v20  ;;  %v858_v26 = vcombine.high %v832_v19, %v840_v20 }
 0x52b   : > { %v849_v27 = vrot.slane %v841_v21, %v2335_v48  ;;  %v856_v28 = vrot.slane %v842_v22, %v2335_v48  ;;  %v865_v31 = vrot.slane %v857_v24, %v2335_v48  ;;  %v872_v33 = vrot.slane %v858_v26, %v2335_v48  ;;  %v1869_v26 = vld [vmem:[#allocation7 + $0x10] sm:$0xff]  }
 0x52d   : > { %v873_v35 = vcombine.low %v849_v27, %v865_v31  ;;  %v874_v36 = vcombine.high %v849_v27, %v865_v31  ;;  %v875_v37 = vcombine.low %v856_v28, %v872_v33  ;;  %v876_v38 = vcombine.high %v856_v28, %v872_v33 }
 0x52f   : > { %v1119_v41 = vpack.c.bf16 %v873_v35, %v873_v35  ;;  %v1120_v43 = vpack.c.bf16 %v874_v36, %v874_v36  ;;  %v1121_v29 = vpack.c.bf16 %v875_v37, %v875_v37  ;;  %v1122_v46 = vpack.c.bf16 %v876_v38, %v876_v38  ;;  %v1870_v37 = vld [vmem:[#allocation7 + $0x18] sm:$0xff]  }
 0x531   : > { %v1128_v23 = vsel %vm1126_vm4, %v1119_v41, 0  ;;  %v1174_v25 = vsel %vm1126_vm4, %v1120_v43, 0  ;;  %v1220_v44 = vsel %vm1126_vm4, %v1121_v29, 0  ;;  %v1266_v45 = vsel %vm1126_vm4, %v1122_v46, 0 }
 0x532   : > { %1743 = vmatpush3.bf16.msra.mxu1 %v1128_v23  ;;  %1749 = vmatpush3.bf16.msra.mxu0 %v1174_v25 }
 0x533   : > { %1754 = vmatprep.subr.bf16.mxu1 %v2061_v32  ;;  %1760 = vmatprep.subr.bf16.mxu0 %v2061_v32 }
 0x535   : > { %1745 = vmatmul.mubr.msk.bf16.vlgmr.msra.gmra.mrb[8].mxu1 %vm1070_vm3, %v1115_v47  ;;  %1751 = vmatmul.mubr.msk.bf16.vlgmr.msra.gmra.mrb[12].mxu0 %vm1070_vm3, %v1116_v49 }
 0x536   : > { %1755 = vmatpush3.bf16.msra.mxu1 %v1220_v44  ;;  %1761 = vmatpush3.bf16.msra.mxu0 %v1266_v45 }
 0x537   : > { %1756 = vmatprep.mubr.msk.bf16.mxu1 %vm2063_vm1, %v2061_v32  ;;  %1762 = vmatprep.mubr.msk.bf16.mxu0 %vm2063_vm1, %v2061_v32 }
 0x538   : > { %1766 = vmatprep.subr.bf16.mxu1 %v2061_v32 }
 0x54c   : > { %v1106_v50 = vpop.xlane.xlu0 %1105 }
 0x54d   : > { %1885 = vrcp.f32 %v1106_v50  ;;  %v1103_v51 = vpop.xlane.xlu1 %1102 }
 0x54e   : > { %1887 = vrcp.f32 %v1103_v51 }
 0x557   : > { %v1886_v54 = vpop.eup %1885 }
 0x558   : > { %v1888_v55 = vpop.eup %1887  ;;  %v1114_v56 = vmul.f32 %v1886_v54, %v2409_v52 }
 0x559   : > { %v1113_v57 = vmul.f32 %v1888_v55, %v2411_v53 }
 0x55a   : > { %v1118_v58 = vpack.c.bf16 %v1114_v56, %v1114_v56 }
 0x55b   : > { %v1117_v59 = vpack.c.bf16 %v1113_v57, %v1113_v57 }
 0x55c   : > { %1763 = vmatmul.mubr.msk.bf16.vlgmr.msra.gmra.mrb[16].mxu0 %vm1070_vm3, %v1118_v58 }
 0x55d   : > { %1757 = vmatmul.mubr.msk.bf16.vlgmr.msra.gmra.mrb[12].mxu1 %vm1070_vm3, %v1117_v59  ;;  %v1687_v59 = vld [vmem:[%s2537_s6] ss:$0 sm:$0xff] }
 0x55e   : > { %1774 = vmatprep.mubr.msk.bf16.mxu1 %vm2063_vm1, %v2061_v32  ;;  %1767 = vmatpush3.bf16.msra.mxu1 %v1867_v60 }
 0x55f   : > { %1768 = vmatprep.subr.bf16.mxu1 %v2061_v32 }
 0x562   : > { %1769 = vmatpush3.bf16.msra.mxu1 %v1868_v61 }
 0x563   : > { %1770 = vmatprep.subr.bf16.mxu1 %v2061_v32 }
 0x566   : > { %1771 = vmatpush3.bf16.msra.mxu1 %v1869_v26 }
 0x567   : > { %1772 = vmatprep.subr.bf16.mxu1 %v2061_v32 }
 0x56a   : > { %1773 = vmatpush3.bf16.msra.mxu1 %v1870_v37 }
 0x608   : > { %v1164_v52 = vpop.f32.mrb[8].mxu1  ;;  %v1210_v62 = vpop.f32.mrb[12].mxu0 }
 0x609   : > { %v1746_v53 = vpop.f32.mrb[9].mxu1  ;;  %v1752_v63 = vpop.f32.mrb[13].mxu0 }
 0x60a   : > { %v1167_v0 = vpop.f32.mrb[10].mxu1  ;;  %v1213_v1 = vpop.f32.mrb[14].mxu0 }
 0x60b   : > { %v1747_v2 = vpop.f32.mrb[11].mxu1  ;;  %v1753_v3 = vpop.f32.mrb[15].mxu0 }
 0x62f   : > { %v1302_v4 = vpop.f32.mrb[16].mxu0 }
 0x630   : > { %v1256_v5 = vpop.f32.mrb[12].mxu1  ;;  %v1324_v6 = vcombine.low %v1210_v62, %v1302_v4  ;;  %v1325_v7 = vcombine.high %v1210_v62, %v1302_v4  ;;  %v1764_v8 = vpop.f32.mrb[17].mxu0 }
 0x631   : > { %v1308_v9 = vcombine.low %v1164_v52, %v1256_v5  ;;  %v1309_v10 = vcombine.high %v1164_v52, %v1256_v5  ;;  %v1758_v11 = vpop.f32.mrb[13].mxu1  ;;  %v1305_v12 = vpop.f32.mrb[18].mxu0 }
 0x632   : > { %v1332_v13 = vrot.slane %v1324_v6, %v2332_v42  ;;  %v1339_v14 = vrot.slane %v1325_v7, %v2332_v42  ;;  %v1259_v15 = vpop.f32.mrb[14].mxu1  ;;  %v1765_v16 = vpop.f32.mrb[19].mxu0 }
 0x633   : > { %v1316_v17 = vrot.slane %v1308_v9, %v2332_v42  ;;  %v1323_v18 = vrot.slane %v1309_v10, %v2332_v42  ;;  %v1759_v19 = vpop.f32.mrb[15].mxu1 }
 0x635   : > { %v1340_v20 = vcombine.low %v1316_v17, %v1332_v13  ;;  %v1341_v21 = vcombine.high %v1316_v17, %v1332_v13  ;;  %v1356_v22 = vcombine.low %v1323_v18, %v1339_v14  ;;  %v1357_v24 = vcombine.high %v1323_v18, %v1339_v14 }
 0x637   : > { %v1348_v27 = vrot.slane %v1340_v20, %v2335_v48  ;;  %v1355_v28 = vrot.slane %v1341_v21, %v2335_v48  ;;  %v1364_v30 = vrot.slane %v1356_v22, %v2335_v48  ;;  %v1371_v31 = vrot.slane %v1357_v24, %v2335_v48 }
 0x639   : > { %v1376_v33 = vcombine.low %v1348_v27, %v1355_v28  ;;  %v1685_v34 = vcombine.high %v1348_v27, %v1355_v28  ;;  %v1392_v35 = vcombine.low %v1364_v30, %v1371_v31  ;;  %v1686_v36 = vcombine.high %v1364_v30, %v1371_v31 }
 0x63b   : > { %v1383_v38 = vrot.slane %v1376_v33, %v2332_v42  ;;  %v1391_v39 = vrot.slane %v1685_v34, %v2332_v42  ;;  %v1399_v40 = vrot.slane %v1392_v35, %v2332_v42  ;;  %v1407_v41 = vrot.slane %v1686_v36, %v2332_v42 }
 0x63d   : > { %v1409_v43 = vcombine.high %v1383_v38, %v1391_v39  ;;  %v1425_v23 = vcombine.high %v1399_v40, %v1407_v41  ;;  %v1408_v25 = vcombine.low %v1383_v38, %v1391_v39  ;;  %v1424_v29 = vcombine.low %v1399_v40, %v1407_v41 }
 0x63f   : > { %v1423_v32 = vrot.slane %v1409_v43, %v2335_v48  ;;  %v1439_v46 = vrot.slane %v1425_v23, %v2335_v48  ;;  %v1416_v47 = vrot.slane %v1408_v25, %v2335_v48  ;;  %v1432_v49 = vrot.slane %v1424_v29, %v2335_v48 }
 0x641   : > { %v1442_v44 = vcombine.low %v1423_v32, %v1439_v46  ;;  %v1441_v45 = vcombine.high %v1416_v47, %v1432_v49  ;;  %v1443_v50 = vcombine.high %v1423_v32, %v1439_v46  ;;  %v1440_v51 = vcombine.low %v1416_v47, %v1432_v49 }
 0x643   : > { %1449 = vrot.lane.b32.xlu1 %v1442_v44, %s2055_s12  ;;  %1445 = vrot.lane.b32.xlu0 %v1441_v45, %s2058_s19  ;;  %s1975_s19 = scalar_lea.vmem %s2489_s10, 128 }
 0x644   : > { %p1976_p11 = scmp.ne.s32.totalorder %s2489_s10, %s1975_s19  ;;  %p1983_p9 = scmp.lt.s32.totalorder %s1981_s21, %s1975_s19 }
 0x646   : > { %p1977_p1 = pnand %p1976_p11, %p2552_p0  ;;  %p1984_p12 = por %p1983_p9, %p1982_p5 }
 0x647   : > { %1453 = vrot.lane.b32.xlu1 %v1443_v50, %s2057_s16  ;;  %s2487_s16 = scalar_lea.hbm %s2538_s7, %s1694_s23 }
 0x648   : > { %p1978_p3 = pneg %p1977_p1 }
 0x64a   : > { %p1985_p2 = pnand %p1984_p12, %p1978_p3 }
 0x6b5   : > { %v1450_v42 = vpop.permute.xlu1 %1449  ;;  %v1446_v54 = vpop.permute.xlu0 %1445 }
 0x6b6   : > { %v1456_v55 = vsel %vm885_vm2, %v1440_v51, %v1446_v54 }
 0x6b7   : > { %v1457_v48 = vsel %vm325_vm0, %v1456_v55, %v1450_v42 }
 0x6b9   : > { %v1454_v56 = vpop.permute.xlu1 %1453 }
 0x6ba   : > { %v1459_v57 = vsel %vm1458_vm5, %v1457_v48, %v1454_v56 }
 0x6bb   : > { %v1460_v58 = vpack.c.bf16 %v1459_v57, %v1459_v57 }
 0x6bd   : > { %1775 = vmatmul.mubr.msk.bf16.vlgmr.msra.gmra.mrb[16].mxu1 %vm1500_vm6, %v1460_v58 }
 0x790   : > { %v1538_v60 = vpop.f32.mrb[16].mxu1 }
 0x791   : > { %v1539_v61 = vadd.f32 %v1687_v59, %v1538_v60  ;;  %v1776_v52 = vpop.f32.mrb[17].mxu1 }
 0x792   : > { %v1541_v62 = vpop.f32.mrb[18].mxu1 }
 0x793   : > { %1544 = vst [vmem:[%s322_s29] sm:$0xff] %v1539_v61  ;;  %v1777_v53 = vpop.f32.mrb[19].mxu1 }
 0x794   : > { %1988 = shalt.err (!%p1985_p2)
}
 0x795   : > { %s1989_s15 = scalar_lea.hbm %s2487_s16, 128  ;;  %s1993_s11 = scalar_lea.hbm %s2538_s7, 256 }
 0x796   : > { %p1990_p13 = scmp.ne.s32.totalorder %s2487_s16, %s1989_s15  ;;  %p1994_p4 = scmp.lt.u32.totalorder %s2487_s16, %s2538_s7 }
 0x797   : > { %p1995_p7 = scmp.lt.u32.totalorder %s1993_s11, %s1989_s15  ;;  %p1997_p11 = scmp.lt.u32.totalorder %s1989_s15, %s2487_s16 }
 0x798   : > { %p1991_p6 = pnand %p1990_p13, %p2552_p0 }
 0x799   : > { %p1996_p8 = por %p1995_p7, %p1994_p4 }
 0x79a   : > { %p1992_p10 = pneg %p1991_p6 }
 0x79b   : > { %p1998_p1 = por %p1997_p11, %p1996_p8 }
 0x79d   : > { %p1999_p3 = pnand %p1998_p1, %p1992_p10 }
 0x79f   : > { %2002 = shalt.err (!%p1999_p3)
}
 0x7a0   : > { %1788 = dma.vmem_to_hbm [thread:$0]  (%p2552_p0), %s2489_s10, 128, %s2487_s16, %s1546_s28  }
 0x7a1 PF: > { %s1571_s12 = sand.u32 1, %s2033_s24   ;;  %p2553_p5 = scmp.ne.s32.totalorder %s2543_s8, 0 }
 0x7a2   : > { %p2554_p9 = scmp.ge.s32.totalorder %s2045_s27, 2  ;;  %s1572_s22 = scalar_lea.sflag [#allocation4], %s1571_s12 }
 0x7a4   : > { %p1802_p12 = pnand %p2554_p9, %p2553_p5 }
 0x7a6   : > { %2028 = dma.done.wait (!%p1802_p12), %s1572_s22, 128  }
 0x7a7   : > { %2030 = vsyncadd (!%p1802_p12), %s1572_s22, 4294967168  ;;  %p21_p2 = scmp.ge.s32.totalorder %s2217_s13, 4   ;;  %s2555_s24 = smov %s2037_s25 }
 0x7a8   : > { %s2556_s25 = smov %s2041_s26  ;;  %s2557_s26 = smov %s2226_s17 }
 0x7a9   : > { %s2558_s27 = smov %s2217_s13  ;;  %23 = sbr.rel (!%p21_p2) target bundleno = 6 (0x6), region = 101 }
 0x7b0   :  { %1577 = vsyncpa [#allocation3], 1 }
 0x7b1   :  { %1579 = vsyncpa [#allocation3 + $0x1], 1 }
 0x7b2   :  { %1580 = vsyncpa [#allocation6], 1 }
 0x7b3   :  { %1581 = vsyncpa [#allocation4], 1 }
 0x7b4   :  { %1583 = vsyncpa [#allocation4 + $0x1], 1 }

</bundles_post_ra>
